<compile_context>
chip_gen: v5e
topology: v5e:2x2
jax: 0.10.0
libtpu: 0.0.40
codegen_flags: <defaults>
</compile_context>

<pallas_src>
import functools

import jax
import jax.numpy as jnp
from jax.experimental import pallas as pl
from jax.experimental.pallas import tpu as pltpu


def _graph_conv_kernel(x_ref, at_ref, w_ref, o_ref):
    # x_ref:  (C_in, NL)           input, batch folded onto the lane axis
    # at_ref: (NL, NL)             block-diag normalized adjacency, transposed
    # w_ref:  (C_out, 2*C_in + 1)  [W1 | W2 | b1+b2]
    # o_ref:  (C_out, NL)          lane-dense output
    x = x_ref[...].astype(jnp.float32)                                   # (C_in, NL)
    # Neighbor gather + mean as a matmul (1x1 conv and mean commute, and the
    # block-diagonal A_big keeps each batch item's aggregation local).
    x_agg = jnp.dot(x, at_ref[...], preferred_element_type=jnp.float32)  # (C_in, NL)
    ones = jnp.ones((1, x.shape[1]), jnp.float32)
    stacked = jnp.concatenate([x, x_agg, ones], axis=0)                  # (2*C_in+1, NL)
    # One fused MXU matmul: W1@x + W2@x_agg + (b1+b2).
    out = jnp.dot(w_ref[...], stacked, preferred_element_type=jnp.float32)
    o_ref[...] = out.astype(o_ref.dtype)


def graph_conv_prepare(adj, w1, b1, w2, b2, n, l):
    """One-time precompute (hoisted out of the per-call path).

    Builds the block-diagonal normalized adjacency (transposed) and the fused
    weight matrix [W1 | W2 | b1+b2].  Duplicate neighbor indices are counted,
    matching gather+mean semantics.
    """
    a = jax.nn.one_hot(adj, l, dtype=jnp.float32).mean(axis=1)           # (L, L)
    a_big_t = jnp.kron(jnp.eye(n, dtype=jnp.float32), a.T)               # (N*L, N*L)
    w_full = jnp.concatenate(
        [w1, w2, (b1 + b2).reshape(-1, 1)], axis=1).astype(jnp.float32)  # (C_out, 2*C_in+1)
    return w_full, a_big_t


@jax.jit
def graph_conv_apply(x, w_full, a_big_t):
    """x: (N, C_in, L) -> (N, C_out, L)."""
    n, c_in, l = x.shape
    c_out = w_full.shape[0]
    nl = n * l

    # Fold batch onto the lane axis (layout plumbing in the wrapper).
    x_flat = jnp.transpose(x, (1, 0, 2)).reshape(c_in, nl)               # (C_in, N*L)

    out_flat = pl.pallas_call(
        _graph_conv_kernel,
        out_shape=jax.ShapeDtypeStruct((c_out, nl), x.dtype),
        grid_spec=pltpu.PrefetchScalarGridSpec(
            num_scalar_prefetch=0,
            grid=(1,),  # single step: per-step overhead dominates at this size
            in_specs=[
                pl.BlockSpec((c_in, nl), lambda i: (0, 0)),
                pl.BlockSpec((nl, nl), lambda i: (0, 0)),
                pl.BlockSpec((c_out, 2 * c_in + 1), lambda i: (0, 0)),
            ],
            out_specs=pl.BlockSpec((c_out, nl), lambda i: (0, 0)),
        ),
        compiler_params=pltpu.CompilerParams(
            dimension_semantics=("arbitrary",)),
    )(x_flat, a_big_t, w_full)

    # Restore (N, C_out, L).
    return out_flat.reshape(c_out, n, l).transpose(1, 0, 2)


def graph_convolution(x, adj, w1, b1, w2, b2):
    """Convenience one-shot wrapper (prepare + apply)."""
    n, _, l = x.shape
    w_full, a_big_t = graph_conv_prepare(adj, w1, b1, w2, b2, n, l)
    return graph_conv_apply(x, w_full, a_big_t)


def _reference(x, adj, w1, b1, w2, b2):
    """Pure-JAX reference matching the PyTorch module semantics exactly."""
    N, C, L = x.shape
    Ladj, K = adj.shape
    state_in = jnp.einsum('oc,ncl->nol', w1, x) + b1[None, :, None]
    gathered = x[..., adj.reshape(-1)].reshape(N, C, Ladj, K).mean(axis=3)
    fwd = jnp.einsum('oc,ncl->nol', w2, gathered) + b2[None, :, None]
    return state_in + fwd


if __name__ == "__main__":
    # Module config: state_dim=4, out_state_dim=4, L=16 nodes, 4 neighbors.
    N, C_IN, L = 2, 4, 16
    C_OUT = C_IN
    N_ADJ = 4

    key = jax.random.PRNGKey(0)
    kx, kw1, kb1, kw2, kb2 = jax.random.split(key, 5)

    x = jax.random.normal(kx, (N, C_IN, L), dtype=jnp.float32)

    # Contour-style adjacency: each node's 4 nearest neighbors on a ring.
    offs = jnp.array([-2, -1, 1, 2], dtype=jnp.int32)
    adj = (jnp.arange(L, dtype=jnp.int32)[:, None] + offs[None, :]) % L   # (L, 4)

    # Deterministic init mimicking nn.Conv1d default (uniform +/- 1/sqrt(fan_in)),
    # fan_in = C_in * kernel_size = C_in * 1.
    bound = 1.0 / (C_IN ** 0.5)
    w1 = jax.random.uniform(kw1, (C_OUT, C_IN), jnp.float32, -bound, bound)
    b1 = jax.random.uniform(kb1, (C_OUT,), jnp.float32, -bound, bound)
    w2 = jax.random.uniform(kw2, (C_OUT, C_IN), jnp.float32, -bound, bound)
    b2 = jax.random.uniform(kb2, (C_OUT,), jnp.float32, -bound, bound)

    # Hoisted precompute (adj / weights are static across calls).
    w_full, a_big_t = graph_conv_prepare(adj, w1, b1, w2, b2, N, L)

    out = graph_conv_apply(x, w_full, a_big_t)
    out = jax.block_until_ready(out)

    ref = _reference(x, adj, w1, b1, w2, b2)
    assert out.shape == (N, C_OUT, L), out.shape
    max_err = float(jnp.max(jnp.abs(out - ref)))
    assert jnp.allclose(out, ref, atol=1e-5, rtol=1e-5), max_err

    print("KERNEL_OK")
</pallas_src>

<mosaic_0001>
module attributes {stable_mosaic.version = 11 : i64} {
  func.func @_graph_conv_kernel(%arg0: i32, %arg1: memref<4x32xf32, #tpu.memory_space<vmem>>, %arg2: memref<32x32xf32, #tpu.memory_space<vmem>>, %arg3: memref<4x9xf32, #tpu.memory_space<vmem>>, %arg4: memref<4x32xf32, #tpu.memory_space<vmem>>) attributes {dimension_semantics = [#tpu.dimension_semantics<arbitrary>], iteration_bounds = array<i64: 1>, scalar_prefetch = 0 : i64, scratch_operands = 0 : i64, tpu.core_type = #tpu.core_type<tc>, window_params = [{pipeline_mode = #tpu.pipeline_mode<synchronous>, transform_indices = @transform_0, window_bounds = array<i64: 4, 32>}, {pipeline_mode = #tpu.pipeline_mode<synchronous>, transform_indices = @transform_1, window_bounds = array<i64: 32, 32>}, {pipeline_mode = #tpu.pipeline_mode<synchronous>, transform_indices = @transform_2, window_bounds = array<i64: 4, 9>}, {pipeline_mode = #tpu.pipeline_mode<synchronous>, transform_indices = @transform_3, window_bounds = array<i64: 4, 32>}]} {
    %c0 = arith.constant 0 : index
    %c0_0 = arith.constant 0 : index
    %0 = vector.load %arg1[%c0, %c0_0] : memref<4x32xf32, #tpu.memory_space<vmem>>, vector<4x32xf32>
    %c0_1 = arith.constant 0 : index
    %c0_2 = arith.constant 0 : index
    %1 = vector.load %arg2[%c0_1, %c0_2] : memref<32x32xf32, #tpu.memory_space<vmem>>, vector<32x32xf32>
    %cst = arith.constant dense<0.000000e+00> : vector<4x32xf32>
    %2 = tpu.matmul %0, %1, %cst {dimension_numbers = #tpu.dot_dimension_numbers<[1], [0], [0], [1], [0, 0, 1, 1], [], []>} : vector<4x32xf32>, vector<32x32xf32>, vector<4x32xf32> -> vector<4x32xf32>
    %cst_3 = arith.constant 1.000000e+00 : f32
    %3 = vector.broadcast %cst_3 : f32 to vector<1x32xf32>
    %4 = tpu.concatenate %0, %2, %3 in 0 : vector<4x32xf32>, vector<4x32xf32>, vector<1x32xf32> -> vector<9x32xf32>
    %c0_4 = arith.constant 0 : index
    %c0_5 = arith.constant 0 : index
    %5 = vector.load %arg3[%c0_4, %c0_5] : memref<4x9xf32, #tpu.memory_space<vmem>>, vector<4x9xf32>
    %cst_6 = arith.constant dense<0.000000e+00> : vector<4x32xf32>
    %6 = tpu.matmul %5, %4, %cst_6 {dimension_numbers = #tpu.dot_dimension_numbers<[1], [0], [0], [1], [0, 0, 1, 1], [], []>} : vector<4x9xf32>, vector<9x32xf32>, vector<4x32xf32> -> vector<4x32xf32>
    %c0_7 = arith.constant 0 : index
    %c0_8 = arith.constant 0 : index
    %7 = vector.load %arg4[%c0_7, %c0_8] : memref<4x32xf32, #tpu.memory_space<vmem>>, vector<4x32xf32>
    tpu.vector_store %arg4[%c0_7, %c0_8], %6 {strides = array<i32>} : memref<4x32xf32, #tpu.memory_space<vmem>>, vector<4x32xf32>,
    return
  }
  func.func @transform_0(%arg0: i32) -> (i32, i32) {
    %c0_i32 = arith.constant 0 : i32
    %c0_i32_0 = arith.constant 0 : i32
    %c0_i32_1 = arith.constant 0 : i32
    return %c0_i32, %c0_i32_0 : i32, i32
  }
  func.func @transform_1(%arg0: i32) -> (i32, i32) {
    %c0_i32 = arith.constant 0 : i32
    %c0_i32_0 = arith.constant 0 : i32
    %c0_i32_1 = arith.constant 0 : i32
    return %c0_i32, %c0_i32_0 : i32, i32
  }
  func.func @transform_2(%arg0: i32) -> (i32, i32) {
    %c0_i32 = arith.constant 0 : i32
    %c0_i32_0 = arith.constant 0 : i32
    %c0_i32_1 = arith.constant 0 : i32
    return %c0_i32, %c0_i32_0 : i32, i32
  }
  func.func @transform_3(%arg0: i32) -> (i32, i32) {
    %c0_i32 = arith.constant 0 : i32
    %c0_i32_0 = arith.constant 0 : i32
    %c0_i32_1 = arith.constant 0 : i32
    return %c0_i32, %c0_i32_0 : i32, i32
  }
}

</mosaic_0001>

<bundles_post_ra>
// kernel: graph_conv_apply.1
= control target key start
LH: loop header
LB: loop body
LE: loop exit
PB: predicated region body
PF: predicated region fallthrough
CT: control target
= control target key end

     0   :  { %8 = vsyncpa [#allocation3], 0  ;;  %s133_s15 = smov [#allocation2]   ;;  %s134_s17 = smov 128   ;;  %s169_s0 = inlined_call_operand.vmem [shape: f32[4,32], index: 0, kind: input, shape index: {}]   ;;  %s170_s1 = inlined_call_operand.hbm [shape: f32[32,32], index: 1, kind: input, shape index: {}]   ;;  %s171_s2 = inlined_call_operand.vmem [shape: f32[4,9], index: 2, kind: input, shape index: {}]   ;;  %s172_s3 = inlined_call_operand.vmem [shape: f32[4,32], index: 3, kind: output, shape index: {}]  }
   0x1   :  { %s15_s14 = sshll.u32 %s170_s1, 4  ;;  %s17_s16 = sshll.u32 %s133_s15, 4  ;;  %s16_s14 = int_to_ptr.hbm [resolvable:$true] %s15_s14  ;;  %s18_s16 = int_to_ptr.vmem [resolvable:$true] %s17_s16 }
   0x2   :  { %s135_s18 = smov 8  }
   0x3   :  { %23 = dma.hbm_to_vmem [thread:$0]  %s16_s14, 512, %s18_s16, [#allocation3], %s134_s17, %s134_s17, %s135_s18  }
   0x4   :  { %131 = dma.done.wait [#allocation3], 512  }
   0x5   :  { %132 = vsyncadd [#allocation3], 4294966784  ;;  %v34_v0 = vld [vmem:[#allocation2 + $0x18] sm:$0xff]  ;;  %v33_v1 = vld [vmem:[#allocation2 + $0x10] sm:$0xff]  ;;  %vm35_vm0 = vcmask 261120   ;;  %vm69_vm1 = vcmask 1040384  }
   0x6   :  { %51 = vmatpush.msra.mxu0 %v34_v0  ;;  %v32_v2 = vld [vmem:[#allocation2 + $0x8] sm:$0xff]  ;;  %v31_v3 = vld [vmem:[#allocation2] sm:$0xff]  ;;  %v136_v5 = vmov 1.0   ;;  %vm62_vm2 = vcmask 1043456   ;;  %vm65_vm3 = vcmask 72704   ;;  %vm93_vm4 = vcmask 257024  }
   0x7   :  { %v30_v4 = vld [vmem:[%s169_s0] sm:$0xf]  ;;  %101 = vmatpush.msk.msra.mxu1 %vm69_vm1, %v136_v5 }
   0x8   :  { %52 = vmatpush.msra.mxu0 %v33_v1  ;;  %v64_v8 = vld [vmem:[%s171_s2] sm:$0xf] }
   0xa   :  { %53 = vmatpush.msra.mxu0 %v32_v2 }
   0xc   :  { %54 = vmatpush.msra.mxu0 %v31_v3 }
   0xd   :  { %100 = vmatmul.msk.f32.vlgmr.msra.gmra.mxu0 %vm35_vm0, %v30_v4 }
  0x8a   :  { %v56_v6 = vpop.f32.mrf.mxu0 }
  0x8b   :  { %v60_v7 = vrot.slane %v56_v6, 4 }
  0x8d   :  { %v63_v9 = vsel %vm62_vm2, %v30_v4, %v60_v7 }
  0x8e   :  { %88 = vmatpush.msra.mxu1 %v63_v9 }
  0x8f   :  { %102 = vmatmul.msk.f32.vlgmr.msra.gmra.mxu1 %vm65_vm3, %v64_v8 }
 0x10c   :  { %v90_v10 = vpop.f32.mrf.mxu1 }
 0x10d   :  { %94 = vst.msk [vmem:[%s172_s3] sm:$0xf] %vm93_vm4, %v90_v10 }
 0x10e   :  { %99 = vsyncpa [#allocation3], 1 }

</bundles_post_ra>
